<compile_context>
chip_gen: v7x
topology: tpu7x:2x2x1
jax: 0.10.0
libtpu: 0.0.40
codegen_flags: <defaults>
</compile_context>

<pallas_src>
import jax
import jax.numpy as jnp
from jax.experimental import pallas as pl
from jax.experimental.pallas import tpu as pltpu

EPS = 1e-5


def _round_up(v, m):
    return -(-v // m) * m


def _make_kernel(n_elems, eps):
    """n_elems = C*H*W (static); eps is the module epsilon."""
    inv_n = 1.0 / float(n_elems)
    inv_nm1 = 1.0 / float(n_elems - 1)          # unbiased (ddof=1), guarded in wrapper

    def kernel(x_ref, g_ref, b_ref, o_ref):
        # x_ref/o_ref: (b_tile, C, HW) tile. g_ref/b_ref: (1, b_tile, C) tile
        # (C on lanes — dense, no 128x lane padding).
        x = x_ref[...].astype(jnp.float32)                     # (bt, C, HW)
        bt, c, _ = x.shape

        # ---- per-sample statistics (two traversals of the VMEM-resident block;
        #      centered second pass for f32 stability, free under HBM roofline) --
        mu = jnp.sum(x, axis=(1, 2), keepdims=True) * inv_n    # (bt, 1, 1)
        xc = x - mu
        var = jnp.sum(xc * xc, axis=(1, 2), keepdims=True) * inv_nm1
        std = jnp.sqrt(var)                                    # unbiased std
        # NOTE: the reference divides by sqrt(std + eps) (std, NOT variance).
        # Reproduced exactly on purpose — do not "fix" it.
        inv = jax.lax.rsqrt(std + eps)                         # (bt, 1, 1)

        # ---- per-(sample, channel) affine from the 2-D conditioning tables -----
        # tiny lane->sublane relayout of b_tile*C elements (negligible, XLU)
        g = g_ref[0].astype(jnp.float32).reshape(bt, c, 1)     # (bt, C, 1)
        b = b_ref[0].astype(jnp.float32).reshape(bt, c, 1)
        a = g * inv                                            # gamma / sqrt(std+eps)

        # ---- single normalize pass: one load + one store per element -----------
        o_ref[...] = (xc * a + b).astype(o_ref.dtype)

    return kernel


def _pick_b_tile(n, per_sample_bytes, *, target_bytes=4 << 20, cap_bytes=6 << 20,
                 min_grid=4):
    """Pick the batch tile.

    Block ~target_bytes (amortizes ~0.35 us/step, near HBM roofline on v7x's
    3.2 TB/s), never above cap_bytes so ~6x the block (2 in-bufs + 2 out-bufs +
    live x + centered temp) stays under the 48 MiB vmem_limit on every
    generation.  Keep grid >= min(n, min_grid) for pipeline overlap and v7x's
    two TensorCores.  Prefer a divisor of n near the target to avoid padding.
    """
    if per_sample_bytes > cap_bytes:
        # TODO(synk): samples this large need a second ('arbitrary') grid axis over
        # HW chunks with scratch sum/sumsq accumulators (pl.when init on chunk 0)
        # and a finalize/affine pass; fall back to one sample per step for now.
        return 1
    bt = max(1, min(n, target_bytes // per_sample_bytes))
    bt = min(bt, cap_bytes // per_sample_bytes)
    if n > 1:
        bt = min(bt, max(1, -(-n // min(n, min_grid))))
    # largest divisor of n that is <= bt; accept it if within 2x of the target
    d = bt
    while d >= 1 and n % d != 0:
        d -= 1
    if d >= 1 and 2 * d >= bt:
        return d
    return bt


def cbn(x, gammas, betas, *, eps=EPS):
    """x: (N, C, H, W) f32, gammas/betas: (N, C) f32 -> (N, C, H, W) f32."""
    n, c, h, w = x.shape
    hw = h * w
    assert c * hw > 1, "per-sample unbiased std needs at least 2 elements"
    itemsize = jnp.dtype(x.dtype).itemsize

    # VMEM footprint of one sample inside an x block (minor dims pad to (8,128)),
    # so C%8 / HW%128 padding is accounted for in the tile-size budget.
    per_sample_vmem = _round_up(c, 8) * _round_up(hw, 128) * itemsize
    b_tile = _pick_b_tile(n, per_sample_vmem)
    grid_len = -(-n // b_tile)
    n_pad = grid_len * b_tile

    x3 = x.reshape(n, c, hw)       # lane axis = H*W (256 here: lane-dense)
    # TODO(synk): for hw % 128 != 0 (7x7 / 14x14 maps) a lane-dense repack of the
    # spatial axis would avoid masked partial stores; hw=256 here is already dense.
    # TODO(synk): for C % 8 != 0 a batch*C sublane fold would avoid sublane padding;
    # the padded bytes are already counted in the VMEM budget above.
    g2, b2 = gammas, betas
    if n_pad != n:
        # Pad the batch so every block is full: the per-sample reduction never sees
        # implicit out-of-bounds data. Zero samples give finite garbage, sliced away.
        x3 = jnp.pad(x3, ((0, n_pad - n), (0, 0), (0, 0)))
        g2 = jnp.pad(g2, ((0, n_pad - n), (0, 0)))
        b2 = jnp.pad(b2, ((0, n_pad - n), (0, 0)))

    # Dense 2-D (N, C) conditioning tables, grouped per grid step (free reshape).
    # C stays on the lane axis -> ~128x smaller in VMEM than an (N, C, 1) layout.
    g3 = g2.reshape(grid_len, b_tile, c)
    b3 = b2.reshape(grid_len, b_tile, c)

    kernel = _make_kernel(c * hw, eps)
    out = pl.pallas_call(
        kernel,
        out_shape=jax.ShapeDtypeStruct((n_pad, c, hw), x.dtype),
        grid_spec=pltpu.PrefetchScalarGridSpec(
            num_scalar_prefetch=0,
            grid=(grid_len,),
            in_specs=[
                # x: b_tile samples per grid step (last two dims == full array dims).
                pl.BlockSpec((b_tile, c, hw), lambda i: (i, 0, 0)),
                # gammas/betas: tiny per-step (1, b_tile, C) blocks, overlapped DMA.
                pl.BlockSpec((1, b_tile, c), lambda i: (i, 0, 0)),
                pl.BlockSpec((1, b_tile, c), lambda i: (i, 0, 0)),
            ],
            out_specs=pl.BlockSpec((b_tile, c, hw), lambda i: (i, 0, 0)),
        ),
        compiler_params=pltpu.CompilerParams(
            dimension_semantics=("parallel",),     # independent batch tiles
            vmem_limit_bytes=48 << 20,             # v5e/v6e: < 128 MiB; v7x: < 64 MiB
        ),
        cost_estimate=pl.CostEstimate(
            flops=6 * n_pad * c * hw,
            transcendentals=2 * n_pad,
            bytes_accessed=(2 * n_pad * c * hw + 4 * n_pad * c) * itemsize,
        ),
    )(x3, g3, b3)

    if n_pad != n:
        out = out[:n]
    return out.reshape(n, c, h, w)


if __name__ == "__main__":
    key = jax.random.PRNGKey(0)
    kx, kg, kb = jax.random.split(key, 3)
    n, c, h, w = 2, 4, 16, 16

    x = jax.random.normal(kx, (n, c, h, w), dtype=jnp.float32)
    # CBN has no learned params of its own; gammas/betas are per-example (N, C).
    gammas = jax.random.normal(kg, (n, c), dtype=jnp.float32)
    betas = jax.random.normal(kb, (n, c), dtype=jnp.float32)

    out = jax.block_until_ready(cbn(x, gammas, betas))

    # Pure-JAX reference mirroring the PyTorch forward exactly
    # (unbiased std, divide by sqrt(std + eps)).
    x_flat = x.reshape(n, -1)
    mu = x_flat.mean(axis=1, keepdims=True)
    std = jnp.sqrt(((x_flat - mu) ** 2).sum(axis=1, keepdims=True)
                   / (x_flat.shape[1] - 1))
    x_norm = (x_flat - mu) / jnp.sqrt(std + EPS)
    ref = (gammas[:, :, None, None] * x_norm.reshape(n, c, h, w)
           + betas[:, :, None, None])
    err = float(jnp.max(jnp.abs(out - ref)))
    assert jnp.allclose(out, ref, atol=1e-5, rtol=1e-5), err

    print("KERNEL_OK")
</pallas_src>

<mosaic_0001>
module attributes {stable_mosaic.version = 11 : i64} {
  func.func @kernel(%arg0: i32, %arg1: memref<1x4x256xf32, #tpu.memory_space<vmem>>, %arg2: memref<1x1x4xf32, #tpu.memory_space<vmem>>, %arg3: memref<1x1x4xf32, #tpu.memory_space<vmem>>, %arg4: memref<1x4x256xf32, #tpu.memory_space<vmem>>) attributes {dimension_semantics = [#tpu.dimension_semantics<parallel>], iteration_bounds = array<i64: 2>, scalar_prefetch = 0 : i64, scratch_operands = 0 : i64, tpu.core_type = #tpu.core_type<tc>, window_params = [{transform_indices = @transform_0, window_bounds = array<i64: 1, 4, 256>}, {transform_indices = @transform_1, window_bounds = array<i64: 1, 1, 4>}, {transform_indices = @transform_2, window_bounds = array<i64: 1, 1, 4>}, {transform_indices = @transform_3, window_bounds = array<i64: 1, 4, 256>}]} {
    %c0 = arith.constant 0 : index
    %c0_0 = arith.constant 0 : index
    %c0_1 = arith.constant 0 : index
    %0 = vector.load %arg1[%c0, %c0_0, %c0_1] : memref<1x4x256xf32, #tpu.memory_space<vmem>>, vector<1x4x256xf32>
    %cst = arith.constant dense<0.000000e+00> : vector<1xf32>
    %1 = vector.multi_reduction <add>, %0, %cst [1, 2] : vector<1x4x256xf32> to vector<1xf32>
    %2 = vector.shape_cast %1 : vector<1xf32> to vector<1x1x1xf32>
    %cst_2 = arith.constant 9.765625E-4 : f32
    %3 = vector.broadcast %cst_2 : f32 to vector<1x1x1xf32>
    %4 = arith.mulf %2, %3 : vector<1x1x1xf32>
    %5 = vector.broadcast %4 : vector<1x1x1xf32> to vector<1x4x256xf32>
    %6 = arith.subf %0, %5 : vector<1x4x256xf32>
    %7 = arith.mulf %6, %6 : vector<1x4x256xf32>
    %cst_3 = arith.constant dense<0.000000e+00> : vector<1xf32>
    %8 = vector.multi_reduction <add>, %7, %cst_3 [1, 2] : vector<1x4x256xf32> to vector<1xf32>
    %9 = vector.shape_cast %8 : vector<1xf32> to vector<1x1x1xf32>
    %cst_4 = arith.constant 9.77517105E-4 : f32
    %10 = vector.broadcast %cst_4 : f32 to vector<1x1x1xf32>
    %11 = arith.mulf %9, %10 : vector<1x1x1xf32>
    %12 = math.sqrt %11 : vector<1x1x1xf32>
    %cst_5 = arith.constant 9.99999974E-6 : f32
    %13 = vector.broadcast %cst_5 : f32 to vector<1x1x1xf32>
    %14 = arith.addf %12, %13 : vector<1x1x1xf32>
    %15 = math.rsqrt %14 : vector<1x1x1xf32>
    %c0_6 = arith.constant 0 : index
    %c0_7 = arith.constant 0 : index
    %c0_8 = arith.constant 0 : index
    %16 = vector.load %arg2[%c0_6, %c0_7, %c0_8] : memref<1x1x4xf32, #tpu.memory_space<vmem>>, vector<1x1x4xf32>
    %17 = vector.shape_cast %16 : vector<1x1x4xf32> to vector<1x4xf32>
    %18 = vector.shape_cast %17 : vector<1x4xf32> to vector<1x4x1xf32>
    %c0_9 = arith.constant 0 : index
    %c0_10 = arith.constant 0 : index
    %c0_11 = arith.constant 0 : index
    %19 = vector.load %arg3[%c0_9, %c0_10, %c0_11] : memref<1x1x4xf32, #tpu.memory_space<vmem>>, vector<1x1x4xf32>
    %20 = vector.shape_cast %19 : vector<1x1x4xf32> to vector<1x4xf32>
    %21 = vector.shape_cast %20 : vector<1x4xf32> to vector<1x4x1xf32>
    %22 = vector.broadcast %15 : vector<1x1x1xf32> to vector<1x4x1xf32>
    %23 = arith.mulf %18, %22 : vector<1x4x1xf32>
    %24 = vector.broadcast %23 : vector<1x4x1xf32> to vector<1x4x256xf32>
    %25 = arith.mulf %6, %24 : vector<1x4x256xf32>
    %26 = vector.broadcast %21 : vector<1x4x1xf32> to vector<1x4x256xf32>
    %27 = arith.addf %25, %26 : vector<1x4x256xf32>
    %c0_12 = arith.constant 0 : index
    %c0_13 = arith.constant 0 : index
    %c0_14 = arith.constant 0 : index
    %28 = vector.load %arg4[%c0_12, %c0_13, %c0_14] : memref<1x4x256xf32, #tpu.memory_space<vmem>>, vector<1x4x256xf32>
    tpu.vector_store %arg4[%c0_12, %c0_13, %c0_14], %27 {strides = array<i32>} : memref<1x4x256xf32, #tpu.memory_space<vmem>>, vector<1x4x256xf32>,
    return
  }
  func.func @transform_0(%arg0: i32) -> (i32, i32, i32) {
    %c0_i32 = arith.constant 0 : i32
    %c0_i32_0 = arith.constant 0 : i32
    %c0_i32_1 = arith.constant 0 : i32
    return %arg0, %c0_i32, %c0_i32_0 : i32, i32, i32
  }
  func.func @transform_1(%arg0: i32) -> (i32, i32, i32) {
    %c0_i32 = arith.constant 0 : i32
    %c0_i32_0 = arith.constant 0 : i32
    %c0_i32_1 = arith.constant 0 : i32
    return %arg0, %c0_i32, %c0_i32_0 : i32, i32, i32
  }
  func.func @transform_2(%arg0: i32) -> (i32, i32, i32) {
    %c0_i32 = arith.constant 0 : i32
    %c0_i32_0 = arith.constant 0 : i32
    %c0_i32_1 = arith.constant 0 : i32
    return %arg0, %c0_i32, %c0_i32_0 : i32, i32, i32
  }
  func.func @transform_3(%arg0: i32) -> (i32, i32, i32) {
    %c0_i32 = arith.constant 0 : i32
    %c0_i32_0 = arith.constant 0 : i32
    %c0_i32_1 = arith.constant 0 : i32
    return %arg0, %c0_i32, %c0_i32_0 : i32, i32, i32
  }
}

</mosaic_0001>

<bundles_post_ra>
// kernel: tpu_custom_call.1
= control target key start
LH: loop header
LB: loop body
LE: loop exit
PB: predicated region body
PF: predicated region fallthrough
CT: control target
= control target key end

     0   :  { %8 = vsyncpa [#allocation3], 0  ;;  %s767_s0 = inlined_call_operand.hbm [shape: f32[2,4,256], index: 0, kind: input, shape index: {}]   ;;  %s768_s1 = inlined_call_operand.vmem [shape: f32[2,1,4], index: 1, kind: input, shape index: {}]   ;;  %s769_s2 = inlined_call_operand.vmem [shape: f32[2,1,4], index: 2, kind: input, shape index: {}]   ;;  %s770_s3 = inlined_call_operand.hbm [shape: f32[2,4,256], index: 3, kind: output, shape index: {}]  }
   0x1   :  { %10 = vsyncpa [#allocation3 + $0x1], 0 }
   0x2   :  { %11 = vsyncpa [#allocation4], 0 }
   0x3   :  { %13 = vsyncpa [#allocation4 + $0x1], 0  ;;  %s590_s12 = smov 0   ;;  %s592_s13 = smov 0  }
   0x4   :  { %s594_s14 = smov 0   ;;  %s596_s15 = smov 0  }
   0x5 LB: > { %s611_s16 = sadd.s32 4294967295, %s565_s15   ;;  %s399_s17 = sadd.s32 4294967294, %s565_s15   ;;  %s565_s15 = sphi %s596_s15, %s785_s15   ;;  %s561_s14 = sphi %s594_s14, %s784_s14   ;;  %s557_s13 = sphi %s592_s13, %s783_s13   ;;  %s553_s12 = sphi %s590_s12, %s782_s12  }
   0x6   : > { %s615_s18 = sadd.s32 1, %s565_s15   ;;  %s26_s19 = sadd.s32 1, %s561_s14 }
   0x7   : > { %s23_s20 = ssub.s32 %s565_s15, %s615_s18  ;;  %p33_p0 = scmp.ne.s32.totalorder %s561_s14, %s557_s13 }
   0x8   : > { %p24_p1 = scmp.eq.s32.totalorder %s23_s20, 0  ;;  %p34_p2 = scmp.eq.s32.totalorder %s565_s15, 0 }
   0x9   : > { %p39_p3 = scmp.ne.s32.totalorder %s557_s13, %s553_s12  ;;  %p40_p4 = scmp.eq.s32.totalorder %s611_s16, 0 }
   0xa   : > { %s627_s21 = scalar_select %p24_p1, %s561_s14, %s26_s19  }
   0xb   : > { %p629_p5 = por %p34_p2, %p33_p0  ;;  %p633_p6 = por %p40_p4, %p39_p3 }
   0xc   : > { %p115_p7 = scmp.eq.s32.totalorder %s611_s16, 1  ;;  %p121_p8 = scmp.eq.s32.totalorder %s399_s17, 1 }
   0xd   : > { %p429_p10 = scmp.lt.s32.totalorder %s565_s15, 2  ;;  %s141_s26 = sand.u32 1, %s561_s14  }
   0xe   : > { %p640_p11 = por %p115_p7, %p33_p0  ;;  %p644_p12 = por %p121_p8, %p39_p3 }
   0xf   : > { %s415_s27 = sshll.u32 %s565_s15, 7  ;;  %s402_s28 = sshll.u32 %s141_s26, 3 }
  0x10   : > { %s774_s24 = scalar_select %p640_p11, 1, 0 }
  0x11   : > { %s775_s25 = scalar_select %p644_p12, 1, 0 }
  0x12   : > { %s653_s4 = scalar_lea.hbm %s767_s0, %s415_s27  ;;  %s145_s5 = scalar_lea.vmem [#allocation2], %s402_s28 }
  0x13   : > { %s153_s6 = sshll.u32 %s145_s5, 4  ;;  %p657_p13 = pnand %p429_p10, %p629_p5  ;;  %s661_s6 = int_to_ptr.vmem [resolvable:$true] %s153_s6 }
  0x14   : > { %s142_s8 = scalar_lea.sflag [#allocation3], %s141_s26  ;;  %s469_s9 = scalar_lea.hbm %s653_s4, 128 }
  0x15   : > { %p470_p2 = scmp.ne.s32.totalorder %s653_s4, %s469_s9  ;;  %p471_p3 = pneg %p657_p13 }
  0x16   : > { %s474_s17 = scalar_lea.hbm %s767_s0, 256  ;;  %p475_p5 = scmp.lt.u32.totalorder %s653_s4, %s767_s0 }
  0x17   : > { %p472_p4 = pnand %p471_p3, %p470_p2  ;;  %p476_p8 = scmp.lt.u32.totalorder %s474_s17, %s469_s9 }
  0x18   : > { %p478_p9 = scmp.lt.u32.totalorder %s469_s9, %s653_s4 }
  0x19   : > { %p473_p7 = pneg %p472_p4  ;;  %p477_p10 = por %p476_p8, %p475_p5 }
  0x1b   : > { %p479_p0 = por %p478_p9, %p477_p10 }
  0x1d   : > { %p480_p1 = pnand %p479_p0, %p473_p7 }
  0x1f   : > { %483 = shalt.err (!%p480_p1)
}
  0x20   : > { %s484_s22 = scalar_lea.vmem %s661_s6, 128  ;;  %s567_s26 = smov [#allocation2]  }
  0x21   : > { %p485_p2 = scmp.ne.s32.totalorder %s661_s6, %s484_s22  ;;  %s489_s27 = sshll.u32 %s567_s26, 4  ;;  %s490_s27 = int_to_ptr.vmem [resolvable:$false] %s489_s27 }
  0x22   : > { %s491_s28 = scalar_lea.vmem %s490_s27, 256  ;;  %p492_p11 = scmp.lt.s32.totalorder %s661_s6, %s490_s27 }
  0x23   : > { %p487_p4 = pnand %p485_p2, %p471_p3  ;;  %p493_p5 = scmp.lt.s32.totalorder %s491_s28, %s484_s22 }
  0x25   : > { %p488_p12 = pneg %p487_p4  ;;  %p494_p8 = por %p493_p5, %p492_p11 }
  0x27   : > { %p495_p9 = pnand %p494_p8, %p488_p12 }
  0x29   : > { %498 = shalt.err (!%p495_p9)
}
  0x2a   : > { %424 = dma.hbm_to_vmem [thread:$0]  (!%p657_p13), %s653_s4, 128, %s661_s6, %s142_s8  }
  0x2b   : > { %p777_p0 = scmp.lt.s32.totalorder %s565_s15, 3  ;;  %p778_p1 = scmp.ge.s32.totalorder %s565_s15, 1 }
  0x2d   : > { %p171_p3 = pnand %p778_p1, %p777_p0 }
  0x2e   : > { %s695_s29 = sand.u32 (!%p171_p3), 1, %s557_s13  }
  0x2f   : > { %174 = sbr.rel (%p171_p3) target bundleno = 432 (0x1b0), region = 32  ;;  %s406_s30 = sshll.u32 (!%p171_p3), %s695_s29, 3 }
  0x30   : > { %s177_s5 = scalar_lea.sflag (!%p171_p3), [#allocation3], %s695_s29  ;;  %s180_s7 = scalar_lea.vmem (!%p171_p3), [#allocation2], %s406_s30 }
  0x36   : > { %544 = dma.done.wait (%p633_p6), %s177_s5, 128  }
  0x37   : > { %546 = vsyncadd (%p633_p6), %s177_s5, 4294967168  ;;  %vm219_vm0 = vcmask 1043456   ;;  %v215_v0 = vld [vmem:[%s180_s7] sm:$0xff]  ;;  %p209_p11 = scmp.lt.s32.totalorder %s611_s16, 1  ;;  %v568_v35 = vmov 839922192   ;;  %v279_v37 = vlaneseq }
  0x38   : > { %v217_v1 = vcombine.high %v215_v0, %v215_v0  ;;  %v220_v2 = vsel %vm219_vm0, %v215_v0, 0.0  ;;  %v277_v36 = vunpack.c.l.s4 %v568_v35  ;;  %s416_s17 = sshll.u32 %s611_s16, 7  ;;  %s208_s19 = scalar_lea.vmem [#allocation5], %s406_s30 }
  0x39   : > { %s210_s4 = scalar_select %p209_p11, %s611_s16, 1  ;;  %v280_v40 = vshrl.u32 %v279_v37, 7 }
  0x3a   : > { %v221_v3 = vsel %vm219_vm0, %v217_v1, 0.0  ;;  %v278_v39 = vunpack.c.0.s8 %v277_v36  ;;  %s311_s20 = sshll.u32 %s208_s19, 4  ;;  %s723_s27 = scalar_lea.hbm %s770_s3, %s416_s17  ;;  %s725_s20 = int_to_ptr.vmem [resolvable:$true] %s311_s20 }
  0x3b   : > { %v222_v4 = vadd.f32 %v221_v3, %v220_v2  ;;  %s211_s9 = scalar_lea.vmem %s768_s1, %s210_s4  ;;  %s214_s11 = scalar_lea.vmem %s769_s2, %s210_s4 }
  0x3c   : > { %v408_v5 = vld [vmem:[%s211_s9] ss:$0 sm:$0xff]  ;;  %v281_v41 = vsub.s32 %v278_v39, %v280_v40  ;;  %s297_s28 = scalar_lea.sflag [#allocation4], %s695_s29  ;;  %s499_s5 = scalar_lea.vmem %s725_s20, 128 }
  0x3d   : > { %223 = vadd.xlane.f32.xlu0 %v222_v4  ;;  %264 = vbcast.lane.b32.xlu1 %v408_v5, 256  ;;  %v409_v6 = vld [vmem:[%s214_s11] ss:$0 sm:$0xff]  ;;  %p500_p6 = scmp.ne.s32.totalorder %s725_s20, %s499_s5  ;;  %p779_p12 = scmp.ne.s32.totalorder %s774_s24, 0 }
  0x3e   : > { %s569_s16 = smov [#allocation5]  }
  0x3f   : > { %p501_p13 = pnand %p500_p6, %p779_p12  ;;  %s503_s30 = sshll.u32 %s569_s16, 4  ;;  %s504_s30 = int_to_ptr.vmem [resolvable:$false] %s503_s30 }
  0x40   : > { %s505_s7 = scalar_lea.vmem %s504_s30, 256  ;;  %p506_p10 = scmp.lt.s32.totalorder %s725_s20, %s504_s30 }
  0x41   : > { %272 = vbcast.lane.b32.xlu1 %v409_v6, 256  ;;  %p502_p7 = pneg %p501_p13  ;;  %p507_p2 = scmp.lt.s32.totalorder %s505_s7, %s499_s5 }
  0x43   : > { %p508_p4 = por %p507_p2, %p506_p10 }
  0x45   : > { %p509_p5 = pnand %p508_p4, %p502_p7 }
  0xaf   : > { %v265_v38 = vpop.permute.xlu1 %264 }
  0xb3   : > { %v273_v43 = vpop.permute.xlu1 %272 }
  0xb4   : > { %v292_v46 = vrot.slane %v273_v43, %v281_v41 }
  0xca   : > { %v224_v7 = vpop.xlane.xlu0 %223 }
  0xcb   : > { %v225_v8 = vrot.slane %v224_v7, 4 }
  0xcd   : > { %v226_v9 = vadd.f32 %v225_v8, %v224_v7 }
  0xcf   : > { %v227_v10 = vrot.slane %v226_v9, 2 }
  0xd1   : > { %v228_v11 = vadd.f32 %v227_v10, %v226_v9 }
  0xd3   : > { %v229_v12 = vrot.slane %v228_v11, 1 }
  0xd5   : > { %v230_v13 = vadd.f32 %v229_v12, %v228_v11 }
  0xd7   : > { %v231_v14 = vmul.f32 0.0009765625, %v230_v13 }
  0xd9   : > { %v232_v15 = vsub.f32 %v215_v0, %v231_v14 }
  0xdb   : > { %v233_v16 = vmul.f32 %v232_v15, %v232_v15 }
  0xdd   : > { %v235_v17 = vcombine.high %v233_v16, %v233_v16  ;;  %v237_v18 = vsel %vm219_vm0, %v233_v16, 0.0 }
  0xdf   : > { %v238_v19 = vsel %vm219_vm0, %v235_v17, 0.0 }
  0xe0   : > { %v239_v20 = vadd.f32 %v238_v19, %v237_v18 }
  0xe2   : > { %240 = vadd.xlane.f32.xlu0 %v239_v20 }
 0x16f   : > { %v241_v21 = vpop.xlane.xlu0 %240 }
 0x170   : > { %v242_v22 = vrot.slane %v241_v21, 4 }
 0x172   : > { %v243_v23 = vadd.f32 %v242_v22, %v241_v21 }
 0x174   : > { %v244_v24 = vrot.slane %v243_v23, 2 }
 0x176   : > { %v245_v25 = vadd.f32 %v244_v24, %v243_v23 }
 0x178   : > { %v246_v26 = vrot.slane %v245_v25, 1 }
 0x17a   : > { %v247_v27 = vadd.f32 %v246_v26, %v245_v25 }
 0x17c   : > { %v248_v28 = vmul.f32 0.0009775171, %v247_v27 }
 0x17e   : > { %465 = vrsqrt.f32 %v248_v28  ;;  %vm251_vm1 = vcmp.eq.f32.partialorder %v248_v28, inf  ;;  %v254_v31 = vand.u32 2147483648, %v248_v28  ;;  %vm253_vm2 = vcmp.eq.f32.partialorder %v248_v28, 0.0 }
 0x188   : > { %v466_v29 = vpop.eup %465 }
 0x189   : > { %v250_v30 = vmul.f32 %v466_v29, %v248_v28 }
 0x18b   : > { %v252_v32 = vsel %vm251_vm1, %v248_v28, %v250_v30 }
 0x18c   : > { %v255_v33 = vsel %vm253_vm2, %v254_v31, %v252_v32 }
 0x18d   : > { %v256_v34 = vadd.f32 1e-05, %v255_v33 }
 0x18f   : > { %467 = vrsqrt.f32 %v256_v34 }
 0x199   : > { %v468_v42 = vpop.eup %467 }
 0x19a   : > { %v274_v44 = vmul.f32 %v468_v42, %v265_v38 }
 0x19c   : > { %v282_v45 = vrot.slane %v274_v44, %v281_v41 }
 0x19e   : > { %v284_v47 = vmul.f32 %v282_v45, %v232_v15 }
 0x1a0   : > { %v294_v48 = vadd.f32 %v292_v46, %v284_v47 }
 0x1a2   : > { %295 = vst [vmem:[%s208_s19] sm:$0xff] %v294_v48 }
 0x1a3   : > { %512 = shalt.err (!%p509_p5)
}
 0x1a4   : > { %s513_s29 = scalar_lea.hbm %s723_s27, 128  ;;  %s517_s8 = scalar_lea.hbm %s770_s3, 256 }
 0x1a5   : > { %p514_p8 = scmp.ne.s32.totalorder %s723_s27, %s513_s29  ;;  %p518_p1 = scmp.lt.u32.totalorder %s723_s27, %s770_s3 }
 0x1a6   : > { %p519_p3 = scmp.lt.u32.totalorder %s517_s8, %s513_s29  ;;  %p521_p6 = scmp.lt.u32.totalorder %s513_s29, %s723_s27 }
 0x1a7   : > { %p515_p9 = pnand %p514_p8, %p779_p12 }
 0x1a8   : > { %p520_p11 = por %p519_p3, %p518_p1 }
 0x1a9   : > { %p516_p0 = pneg %p515_p9 }
 0x1aa   : > { %p522_p13 = por %p521_p6, %p520_p11 }
 0x1ac   : > { %p523_p7 = pnand %p522_p13, %p516_p0 }
 0x1ae   : > { %526 = shalt.err (!%p523_p7)
}
 0x1af   : > { %419 = dma.vmem_to_hbm [thread:$0]  (%p779_p12), %s725_s20, 128, %s723_s27, %s297_s28  }
 0x1b0 PF: > { %s323_s23 = sand.u32 1, %s553_s12   ;;  %p780_p10 = scmp.ne.s32.totalorder %s775_s25, 0 }
 0x1b1   : > { %p781_p2 = scmp.ge.s32.totalorder %s565_s15, 2  ;;  %s324_s11 = scalar_lea.sflag [#allocation4], %s323_s23 }
 0x1b3   : > { %p426_p4 = pnand %p781_p2, %p780_p10 }
 0x1b5   : > { %548 = dma.done.wait (!%p426_p4), %s324_s11, 128  }
 0x1b6   : > { %550 = vsyncadd (!%p426_p4), %s324_s11, 4294967168  ;;  %p16_p5 = scmp.ge.s32.totalorder %s615_s18, 4   ;;  %s782_s12 = smov %s557_s13 }
 0x1b7   : > { %s783_s13 = smov %s561_s14  ;;  %s784_s14 = smov %s627_s21 }
 0x1b8   : > { %s785_s15 = smov %s615_s18  ;;  %18 = sbr.rel (!%p16_p5) target bundleno = 5 (0x5), region = 83 }
 0x1bf   :  { %329 = vsyncpa [#allocation3], 1 }
 0x1c0   :  { %331 = vsyncpa [#allocation3 + $0x1], 1 }
 0x1c1   :  { %332 = vsyncpa [#allocation4], 1 }
 0x1c2   :  { %334 = vsyncpa [#allocation4 + $0x1], 1 }

</bundles_post_ra>
